<compile_context>
chip_gen: v7x
topology: tpu7x:2x2x1
jax: 0.10.0
libtpu: 0.0.40
codegen_flags: <defaults>
</compile_context>

<pallas_src>
import functools
import math
from itertools import combinations

import jax
import jax.numpy as jnp
from jax.experimental import pallas as pl
from jax.experimental.pallas import tpu as pltpu

_LANE = 128


def _round_up(x, m):
    return ((x + m - 1) // m) * m


def _choose_tiling(D, E, B, max_block_d):
    """Pick the contraction tile TD and the VMEM limit from a per-chip budget."""
    try:
        vmem_cap = int(pltpu.get_tpu_info().vmem_capacity_bytes)
    except Exception:  # interpret mode / unknown backend
        vmem_cap = 128 * 1024 * 1024
    # Working-set budget: at most ~half of physical VMEM (binding on v7x's
    # 64 MiB), never more than 48 MiB even on 128 MiB parts (v5e/v6e).
    budget = min(vmem_cap // 2, 48 * 1024 * 1024)

    D128 = _round_up(D, _LANE)
    E_lane = _round_up(E, _LANE)      # VMEM lane padding only (HBM stays at E)
    B_sub = _round_up(B, 16)          # bf16 sublane-packing estimate

    per_td = 3 * E_lane * 2 + 2 * B_sub * 2            # w (<=3 bufs) + x (2 bufs), bf16
    fixed = _round_up(B, 8) * E_lane * 4 + (1 << 20)   # e_acc scratch + slack
    td_cap = max((budget - fixed) // per_td, _LANE)
    TD = max((min(int(max_block_d), int(td_cap), D128) // _LANE) * _LANE, _LANE)
    D_pad = _round_up(D128, TD)
    num_steps = D_pad // TD

    n_w_buf = 3 if 3 <= num_steps <= 8 else 2          # deeper prefetch for few big steps
    working = (n_w_buf * TD * E_lane * 2 + 2 * B_sub * TD * 2
               + _round_up(B, 8) * E_lane * 4)
    vmem_limit = int(min(vmem_cap, max(working + (8 << 20), 32 * 1024 * 1024)))
    return TD, D_pad, num_steps, n_w_buf, vmem_limit


def _margin_contrastive_kernel(x_ref, w_ref, o_ref, e_acc, *,
                               margin, inv_num_pairs, batch):
    k = pl.program_id(0)

    @pl.when(k == 0)
    def _():
        e_acc[...] = jnp.zeros_like(e_acc)

    # e += x_chunk @ w_chunk   (bf16 inputs, f32 MXU accumulation).
    e_acc[...] += jnp.dot(x_ref[...], w_ref[...],
                          preferred_element_type=jnp.float32)

    @pl.when(k == pl.num_programs(0) - 1)
    def _():
        e = e_acc[...]                                               # (B, E) f32
        # Gram matrix on the MXU: G[i, j] = <e_i, e_j> (contract last dims).
        g = jax.lax.dot_general(e, e, (((1,), (1,)), ((), ())),
                                preferred_element_type=jnp.float32)  # (B, B)
        sq = jnp.sum(e * e, axis=1, keepdims=True)                   # (B, 1) ||e_i||^2
        # ||e_i - e_j||^2, clamped (fp cancellation can give tiny negatives).
        d2 = jnp.maximum(sq + sq.T - 2.0 * g, 0.0)                   # (B, B)
        dist = jnp.sqrt(d2)
        hinge = jnp.maximum(jnp.float32(margin) - dist, 0.0)
        row = jax.lax.broadcasted_iota(jnp.int32, (batch, batch), 0)
        col = jax.lax.broadcasted_iota(jnp.int32, (batch, batch), 1)
        upper = (col > row).astype(jnp.float32)   # strict upper triangle = C(B,2) pairs
        o_ref[0, 0] = jnp.sum(hinge * upper) * jnp.float32(inv_num_pairs)


def prepare_embedding_weights(w, *, batch, max_block_d=8192):
    """One-time prep of the Linear weight: bf16 cast + zero-pad of the D axis.

    Cache the result across training steps; re-casting/padding w on every call
    costs ~3x the HBM traffic the kernel itself needs for w.
    """
    D, E = w.shape
    _, D_pad, _, _, _ = _choose_tiling(D, E, batch, max_block_d)
    return jnp.pad(w.astype(jnp.bfloat16), ((0, D_pad - D), (0, 0)))


def margin_contrastive_loss(x_nchw, w_prepared, margin, *, max_block_d=8192):
    """x_nchw: (B, ...); w_prepared: from prepare_embedding_weights; margin: float.

    The Linear bias is intentionally omitted: it cancels exactly in e_i - e_j,
    so it has zero effect on this loss (add it outside if e is reused elsewhere).
    """
    B = x_nchw.shape[0]
    assert B >= 2, "need at least 2 samples to form a pair"
    D = math.prod(x_nchw.shape[1:])
    E = int(w_prepared.shape[1])
    TD, D_pad, num_steps, n_w_buf, vmem_limit = _choose_tiling(D, E, B, max_block_d)
    assert w_prepared.shape[0] == D_pad and w_prepared.dtype == jnp.bfloat16, (
        "w_prepared must come from prepare_embedding_weights with the same "
        "batch / max_block_d settings")
    P = B * (B - 1) // 2

    # Flatten row-major exactly like torch .view(B, -1); zero-pad D (no-op rows).
    x_flat = jnp.pad(x_nchw.reshape(B, D).astype(jnp.bfloat16),
                     ((0, 0), (0, D_pad - D)))

    kernel = functools.partial(
        _margin_contrastive_kernel,
        margin=float(margin), inv_num_pairs=1.0 / float(P), batch=B)

    w_spec_kwargs = {}
    if n_w_buf == 3:
        # Few large steps: a third w buffer keeps the DMA engine saturated.
        w_spec_kwargs["pipeline_mode"] = pl.Buffered(3)

    cost = pl.CostEstimate(
        flops=2 * B * D_pad * E + 2 * B * B * E + 8 * B * B,
        transcendentals=B * B,                               # sqrt
        bytes_accessed=B * D_pad * 2 + D_pad * E * 2 + 4)

    out = pl.pallas_call(
        kernel,
        out_shape=jax.ShapeDtypeStruct((1, 1), jnp.float32),
        grid_spec=pltpu.PrefetchScalarGridSpec(
            num_scalar_prefetch=0,
            grid=(num_steps,),
            in_specs=[
                pl.BlockSpec((B, TD), lambda k: (0, k)),                   # x chunk, bf16
                pl.BlockSpec((TD, E), lambda k: (k, 0), **w_spec_kwargs),  # w chunk, bf16
            ],
            out_specs=pl.BlockSpec((1, 1), lambda k: (0, 0),
                                   memory_space=pltpu.MemorySpace.SMEM),
            scratch_shapes=[pltpu.VMEM((B, E), jnp.float32)],
        ),
        compiler_params=pltpu.CompilerParams(
            dimension_semantics=("arbitrary",),   # D is a reduction axis
            vmem_limit_bytes=vmem_limit),
        cost_estimate=cost,
    )(x_flat, w_prepared)
    # TODO(synk): forward-only; guard sqrt(d2) at d2==0 before adding a VJP.
    # Note: single-TC streaming kernel; a two-core split of D on v7x (per-core
    # partial e accumulators) is only worthwhile if this loss is on the critical path.
    return out[0, 0]


if __name__ == "__main__":
    # Small deterministic example: batch=4, channels=4, spatial=16x16, embedding=32.
    B, C, H, W = 4, 4, 16, 16
    E = 32
    D = C * H * W
    margin = 10.0   # pair-difference norms are ~8 here, so the hinge is active

    key = jax.random.PRNGKey(0)
    kx, kw, kb = jax.random.split(key, 3)
    x = jax.random.normal(kx, (B, C, H, W), jnp.float32)
    # Deterministic "embedding network" params (single Linear layer).
    w = jax.random.normal(kw, (D, E), jnp.float32) * (1.0 / jnp.sqrt(D))
    b = jax.random.normal(kb, (1, E), jnp.float32) * 0.01   # cancels in e_i - e_j

    # Pure-JAX f32 reference following the PyTorch module semantics (with bias).
    e_ref = x.reshape(B, D) @ w + b
    pairs = jnp.asarray(list(combinations(range(B), 2)))
    v_ref = e_ref[pairs[:, 0]] - e_ref[pairs[:, 1]]
    ref = jnp.mean(jnp.maximum(margin - jnp.linalg.norm(v_ref, axis=1), 0.0))

    # 1) Auto tiling: single K step at this tiny D (TD derived from VMEM budget).
    w_prep = prepare_embedding_weights(w, batch=B)
    loss = jax.block_until_ready(margin_contrastive_loss(x, w_prep, margin))
    # Tolerance accounts for bf16 matmul inputs (f32 accumulation).
    assert jnp.allclose(loss, ref, atol=5e-2, rtol=5e-2), (loss, ref)

    # 2) Forced small tile -> 4-step pipeline, exercising the Buffered(3) w prefetch path.
    w_prep_small = prepare_embedding_weights(w, batch=B, max_block_d=256)
    loss2 = jax.block_until_ready(
        margin_contrastive_loss(x, w_prep_small, margin, max_block_d=256))
    assert jnp.allclose(loss2, ref, atol=5e-2, rtol=5e-2), (loss2, ref)

    print("KERNEL_OK")
</pallas_src>

<mosaic_0001>
module attributes {stable_mosaic.version = 11 : i64} {
  func.func @_margin_contrastive_kernel(%arg0: i32, %arg1: memref<4x1024xbf16, #tpu.memory_space<vmem>>, %arg2: memref<1024x32xbf16, #tpu.memory_space<vmem>>, %arg3: memref<1x1xf32, #tpu.memory_space<smem>>, %arg4: memref<4x32xf32, #tpu.memory_space<vmem>>) attributes {dimension_semantics = [#tpu.dimension_semantics<arbitrary>], iteration_bounds = array<i64: 1>, scalar_prefetch = 0 : i64, scratch_operands = 1 : i64, tpu.core_type = #tpu.core_type<tc>, window_params = [{transform_indices = @transform_0, window_bounds = array<i64: 4, 1024>}, {transform_indices = @transform_1, window_bounds = array<i64: 1024, 32>}, {transform_indices = @transform_2, window_bounds = array<i64: 1, 1>}]} {
    %c0_i32 = arith.constant 0 : i32
    %0 = arith.cmpi eq, %arg0, %c0_i32 : i32
    %1 = arith.extui %0 : i1 to i32
    %c0_i32_0 = arith.constant 0 : i32
    %2 = arith.cmpi ne, %1, %c0_i32_0 : i32
    scf.if %2 {
      %cst_10 = arith.constant 0.000000e+00 : f32
      %12 = vector.broadcast %cst_10 : f32 to vector<4x32xf32>
      %c0_11 = arith.constant 0 : index
      %c0_12 = arith.constant 0 : index
      %13 = vector.load %arg4[%c0_11, %c0_12] : memref<4x32xf32, #tpu.memory_space<vmem>>, vector<4x32xf32>
      tpu.vector_store %arg4[%c0_11, %c0_12], %12 {strides = array<i32>} : memref<4x32xf32, #tpu.memory_space<vmem>>, vector<4x32xf32>,
    } else {
    }
    %c0 = arith.constant 0 : index
    %c0_1 = arith.constant 0 : index
    %3 = vector.load %arg4[%c0, %c0_1] : memref<4x32xf32, #tpu.memory_space<vmem>>, vector<4x32xf32>
    %c0_2 = arith.constant 0 : index
    %c0_3 = arith.constant 0 : index
    %4 = vector.load %arg1[%c0_2, %c0_3] : memref<4x1024xbf16, #tpu.memory_space<vmem>>, vector<4x1024xbf16>
    %c0_4 = arith.constant 0 : index
    %c0_5 = arith.constant 0 : index
    %5 = vector.load %arg2[%c0_4, %c0_5] : memref<1024x32xbf16, #tpu.memory_space<vmem>>, vector<1024x32xbf16>
    %cst = arith.constant dense<0.000000e+00> : vector<4x32xf32>
    %6 = tpu.matmul %4, %5, %cst {dimension_numbers = #tpu.dot_dimension_numbers<[1], [0], [0], [1], [0, 0, 1, 1], [], []>} : vector<4x1024xbf16>, vector<1024x32xbf16>, vector<4x32xf32> -> vector<4x32xf32>
    %7 = arith.addf %3, %6 : vector<4x32xf32>
    %c0_6 = arith.constant 0 : index
    %c0_7 = arith.constant 0 : index
    %8 = vector.load %arg4[%c0_6, %c0_7] : memref<4x32xf32, #tpu.memory_space<vmem>>, vector<4x32xf32>
    tpu.vector_store %arg4[%c0_6, %c0_7], %7 {strides = array<i32>} : memref<4x32xf32, #tpu.memory_space<vmem>>, vector<4x32xf32>,
    %c0_i32_8 = arith.constant 0 : i32
    %9 = arith.cmpi eq, %arg0, %c0_i32_8 : i32
    %10 = arith.extui %9 : i1 to i32
    %c0_i32_9 = arith.constant 0 : i32
    %11 = arith.cmpi ne, %10, %c0_i32_9 : i32
    scf.if %11 {
      %c0_10 = arith.constant 0 : index
      %c0_11 = arith.constant 0 : index
      %12 = vector.load %arg4[%c0_10, %c0_11] : memref<4x32xf32, #tpu.memory_space<vmem>>, vector<4x32xf32>
      %cst_12 = arith.constant dense<0.000000e+00> : vector<4x4xf32>
      %13 = tpu.matmul %12, %12, %cst_12 {dimension_numbers = #tpu.dot_dimension_numbers<[1], [1], [0], [0], [0, 0, 1, 0], [], []>} : vector<4x32xf32>, vector<4x32xf32>, vector<4x4xf32> -> vector<4x4xf32>
      %14 = arith.mulf %12, %12 : vector<4x32xf32>
      %cst_13 = arith.constant dense<0.000000e+00> : vector<4xf32>
      %15 = vector.multi_reduction <add>, %14, %cst_13 [1] : vector<4x32xf32> to vector<4xf32>
      %16 = vector.shape_cast %15 : vector<4xf32> to vector<4x1xf32>
      %17 = tpu.transpose %16, [1, 0] : vector<4x1xf32> -> vector<1x4xf32>
      %18 = vector.broadcast %16 : vector<4x1xf32> to vector<4x4xf32>
      %19 = vector.broadcast %17 : vector<1x4xf32> to vector<4x4xf32>
      %20 = arith.addf %18, %19 : vector<4x4xf32>
      %cst_14 = arith.constant 2.000000e+00 : f32
      %21 = vector.broadcast %cst_14 : f32 to vector<4x4xf32>
      %22 = arith.mulf %21, %13 : vector<4x4xf32>
      %23 = arith.subf %20, %22 : vector<4x4xf32>
      %cst_15 = arith.constant 0.000000e+00 : f32
      %24 = vector.broadcast %cst_15 : f32 to vector<4x4xf32>
      %25 = arith.maximumf %23, %24 : vector<4x4xf32>
      %26 = math.sqrt %25 : vector<4x4xf32>
      %cst_16 = arith.constant 1.000000e+01 : f32
      %27 = vector.broadcast %cst_16 : f32 to vector<4x4xf32>
      %28 = arith.subf %27, %26 : vector<4x4xf32>
      %cst_17 = arith.constant 0.000000e+00 : f32
      %29 = vector.broadcast %cst_17 : f32 to vector<4x4xf32>
      %30 = arith.maximumf %28, %29 : vector<4x4xf32>
      %31 = tpu.iota {dimensions = array<i32: 0>} : vector<4x4xi32>
      %32 = tpu.iota {dimensions = array<i32: 1>} : vector<4x4xi32>
      %33 = arith.cmpi sgt, %32, %31 : vector<4x4xi32>
      %34 = arith.extui %33 : vector<4x4xi1> to vector<4x4xi32>
      %35 = arith.sitofp %34 : vector<4x4xi32> to vector<4x4xf32>
      %36 = arith.mulf %30, %35 : vector<4x4xf32>
      %37 = vector.shape_cast %36 : vector<4x4xf32> to vector<1x4x4xf32>
      %cst_18 = arith.constant dense<0.000000e+00> : vector<1xf32>
      %38 = vector.multi_reduction <add>, %37, %cst_18 [1, 2] : vector<1x4x4xf32> to vector<1xf32>
      %39 = vector.shape_cast %38 : vector<1xf32> to vector<1x1x1xf32>
      %40 = vector.extract %39[0, 0, 0] : f32 from vector<1x1x1xf32>
      %cst_19 = arith.constant 0.166666672 : f32
      %41 = arith.mulf %40, %cst_19 : f32
      %c0_20 = arith.constant 0 : index
      %c0_21 = arith.constant 0 : index
      %42 = memref.load %arg3[%c0_20, %c0_21] : memref<1x1xf32, #tpu.memory_space<smem>>
      memref.store %41, %arg3[%c0_20, %c0_21] : memref<1x1xf32, #tpu.memory_space<smem>>
    } else {
    }
    return
  }
  func.func @transform_0(%arg0: i32) -> (i32, i32) {
    %c0_i32 = arith.constant 0 : i32
    %c0_i32_0 = arith.constant 0 : i32
    return %c0_i32, %arg0 : i32, i32
  }
  func.func @transform_1(%arg0: i32) -> (i32, i32) {
    %c0_i32 = arith.constant 0 : i32
    %c0_i32_0 = arith.constant 0 : i32
    return %arg0, %c0_i32 : i32, i32
  }
  func.func @transform_2(%arg0: i32) -> (i32, i32) {
    %c0_i32 = arith.constant 0 : i32
    %c0_i32_0 = arith.constant 0 : i32
    %c0_i32_1 = arith.constant 0 : i32
    return %c0_i32, %c0_i32_0 : i32, i32
  }
}

</mosaic_0001>

<bundles_post_ra>
// kernel: tpu_custom_call.1
= control target key start
LH: loop header
LB: loop body
LE: loop exit
PB: predicated region body
PF: predicated region fallthrough
CT: control target
= control target key end

     0   :  { %v156_v28 = vlaneseq  ;;  %v1155_v36 = vmov 1983009808   ;;  %s1400_s0 = inlined_call_operand.vmem [shape: bf16[4,1024], index: 0, kind: input, shape index: {}]   ;;  %s1401_s1 = inlined_call_operand.vmem [shape: bf16[1024,32], index: 1, kind: input, shape index: {}]   ;;  %s1402_s2 = inlined_call_operand.hbm [shape: f32[1,1], index: 2, kind: output, shape index: {}]  }
   0x1   :  { %v1075_v0 = vld [vmem:[%s1401_s1 + $0x40] sm:$0xff]   ;;  %v1079_v4 = vld [vmem:[%s1401_s1 + $0x48] sm:$0xff]   ;;  %v1083_v8 = vld [vmem:[%s1401_s1 + $0x50] sm:$0xff]   ;;  %v154_v37 = vunpack.c.l.s4 %v1155_v36 }
   0x2   :  { %v1076_v1 = vld [vmem:[%s1401_s1 + $0xc0] sm:$0xff]   ;;  %974 = vmatprep.subr.bf16.mxu0 %v1075_v0  ;;  %v1080_v5 = vld [vmem:[%s1401_s1 + $0xc8] sm:$0xff]   ;;  %v1084_v9 = vld [vmem:[%s1401_s1 + $0xd0] sm:$0xff]   ;;  %v1271_v33 = vshrl.u32 %v156_v28, 7 }
   0x3   :  { %v1077_v2 = vld [vmem:[%s1401_s1] sm:$0xff]   ;;  %996 = vmatprep.subr.bf16.mxu1 %v1076_v1  ;;  %v1081_v6 = vld [vmem:[%s1401_s1 + $0x8] sm:$0xff]   ;;  %v1085_v10 = vld [vmem:[%s1401_s1 + $0x10] sm:$0xff]   ;;  %v155_v39 = vunpack.c.0.s8 %v154_v37 }
   0x4   :  { %v1078_v3 = vld [vmem:[%s1401_s1 + $0x80] sm:$0xff]   ;;  %975 = vmatpush3.bf16.msra.mxu0 %v1077_v2  ;;  %v1082_v7 = vld [vmem:[%s1401_s1 + $0x88] sm:$0xff]   ;;  %v1086_v11 = vld [vmem:[%s1401_s1 + $0x90] sm:$0xff]  }
   0x5   :  { %997 = vmatpush3.bf16.msra.mxu1 %v1078_v3  ;;  %976 = vmatprep.subr.bf16.mxu0 %v1079_v4  ;;  %v1087_v12 = vld [vmem:[%s1401_s1 + $0x58] sm:$0xff]   ;;  %v1091_v16 = vld [vmem:[%s1401_s1 + $0x60] sm:$0xff]   ;;  %v1095_v20 = vld [vmem:[%s1401_s1 + $0x68] sm:$0xff]   ;;  %v1283_v41 = vsub.s32 %v155_v39, %v1271_v33 }
   0x6   :  { %998 = vmatprep.subr.bf16.mxu1 %v1080_v5  ;;  %v1088_v13 = vld [vmem:[%s1401_s1 + $0xd8] sm:$0xff]   ;;  %v1092_v17 = vld [vmem:[%s1401_s1 + $0xe0] sm:$0xff]   ;;  %v1096_v21 = vld [vmem:[%s1401_s1 + $0xe8] sm:$0xff]  }
   0x7   :  { %v1089_v14 = vld [vmem:[%s1401_s1 + $0x18] sm:$0xff]   ;;  %v1093_v18 = vld [vmem:[%s1401_s1 + $0x20] sm:$0xff]   ;;  %v1097_v22 = vld [vmem:[%s1401_s1 + $0x28] sm:$0xff]  }
   0x8   :  { %977 = vmatpush3.bf16.msra.mxu0 %v1081_v6  ;;  %v1090_v15 = vld [vmem:[%s1401_s1 + $0x98] sm:$0xff]   ;;  %v1094_v19 = vld [vmem:[%s1401_s1 + $0xa0] sm:$0xff]   ;;  %v1098_v23 = vld [vmem:[%s1401_s1 + $0xa8] sm:$0xff]  }
   0x9   :  { %999 = vmatpush3.bf16.msra.mxu1 %v1082_v7  ;;  %978 = vmatprep.subr.bf16.mxu0 %v1083_v8  ;;  %v1099_v24 = vld [vmem:[%s1401_s1 + $0x70] sm:$0xff]   ;;  %v1103_v29 = vld [vmem:[%s1401_s1 + $0x78] sm:$0xff]   ;;  %v20_v34 = vld [vmem:[%s1400_s0] sm:$0xff] }
   0xa   :  { %1000 = vmatprep.subr.bf16.mxu1 %v1084_v9  ;;  %v1100_v25 = vld [vmem:[%s1401_s1 + $0xf0] sm:$0xff]   ;;  %v1104_v30 = vld [vmem:[%s1401_s1 + $0xf8] sm:$0xff]   ;;  %v1108_v35 = vld [vmem:[%s1401_s1 + $0x140] sm:$0xff]   ;;  %v152_v40 = vcombine.high %v20_v34, %v20_v34  ;;  %v159_v42 = vrot.slane %v20_v34, %v1283_v41 }
   0xb   :  { %v1101_v26 = vld [vmem:[%s1401_s1 + $0x30] sm:$0xff]   ;;  %v1105_v31 = vld [vmem:[%s1401_s1 + $0x38] sm:$0xff]   ;;  %v1109_v38 = vld [vmem:[%s1401_s1 + $0x1c0] sm:$0xff]  }
   0xc   :  { %979 = vmatpush3.bf16.msra.mxu0 %v1085_v10  ;;  %v1102_v27 = vld [vmem:[%s1401_s1 + $0xb0] sm:$0xff]   ;;  %v1106_v32 = vld [vmem:[%s1401_s1 + $0xb8] sm:$0xff]   ;;  %v166_v43 = vrot.slane %v152_v40, %v1283_v41  ;;  %v1110_v44 = vld [vmem:[%s1401_s1 + $0x100] sm:$0xff]   ;;  %v167_v46 = vcombine.high %v159_v42, %v159_v42 }
   0xd   :  { %1001 = vmatpush3.bf16.msra.mxu1 %v1086_v11  ;;  %980 = vmatprep.subr.bf16.mxu0 %v1087_v12  ;;  %v1111_v45 = vld [vmem:[%s1401_s1 + $0x180] sm:$0xff]   ;;  %v1112_v48 = vld [vmem:[%s1401_s1 + $0x148] sm:$0xff]   ;;  %v1116_v52 = vld [vmem:[%s1401_s1 + $0x150] sm:$0xff]  }
   0xe   :  { %1002 = vmatprep.subr.bf16.mxu1 %v1088_v13  ;;  %v168_v47 = vcombine.high %v166_v43, %v166_v43  ;;  %v1113_v49 = vld [vmem:[%s1401_s1 + $0x1c8] sm:$0xff]   ;;  %610 = vmatprep.mubr.bf16.mxu0 %v167_v46  ;;  %v1117_v53 = vld [vmem:[%s1401_s1 + $0x1d0] sm:$0xff]   ;;  %v1120_v56 = vld [vmem:[%s1401_s1 + $0x158] sm:$0xff]  }
   0xf   :  { %v1114_v50 = vld [vmem:[%s1401_s1 + $0x108] sm:$0xff]   ;;  %v1118_v54 = vld [vmem:[%s1401_s1 + $0x110] sm:$0xff]   ;;  %v1121_v57 = vld [vmem:[%s1401_s1 + $0x1d8] sm:$0xff]  }
  0x10   :  { %981 = vmatpush3.bf16.msra.mxu0 %v1089_v14  ;;  %650 = vmatprep.mubr.bf16.mxu1 %v168_v47  ;;  %v1115_v51 = vld [vmem:[%s1401_s1 + $0x188] sm:$0xff]   ;;  %v1119_v55 = vld [vmem:[%s1401_s1 + $0x190] sm:$0xff]   ;;  %v1122_v58 = vld [vmem:[%s1401_s1 + $0x118] sm:$0xff]  }
  0x11   :  { %1003 = vmatpush3.bf16.msra.mxu1 %v1090_v15  ;;  %982 = vmatprep.subr.bf16.mxu0 %v1091_v16  ;;  %v1123_v59 = vld [vmem:[%s1401_s1 + $0x198] sm:$0xff]   ;;  %v1124_v60 = vld [vmem:[%s1401_s1 + $0x160] sm:$0xff]   ;;  %v1128_v0 = vld [vmem:[%s1401_s1 + $0x168] sm:$0xff]  }
  0x12   :  { %1004 = vmatprep.subr.bf16.mxu1 %v1092_v17  ;;  %v1125_v61 = vld [vmem:[%s1401_s1 + $0x1e0] sm:$0xff]   ;;  %v1129_v1 = vld [vmem:[%s1401_s1 + $0x1e8] sm:$0xff]   ;;  %v1132_v4 = vld [vmem:[%s1401_s1 + $0x170] sm:$0xff]  }
  0x13   :  { %v1126_v62 = vld [vmem:[%s1401_s1 + $0x120] sm:$0xff]   ;;  %v1130_v2 = vld [vmem:[%s1401_s1 + $0x128] sm:$0xff]   ;;  %v1133_v5 = vld [vmem:[%s1401_s1 + $0x1f0] sm:$0xff]  }
  0x14   :  { %983 = vmatpush3.bf16.msra.mxu0 %v1093_v18  ;;  %v1127_v63 = vld [vmem:[%s1401_s1 + $0x1a0] sm:$0xff]   ;;  %v1131_v3 = vld [vmem:[%s1401_s1 + $0x1a8] sm:$0xff]  }
  0x15   :  { %1005 = vmatpush3.bf16.msra.mxu1 %v1094_v19  ;;  %984 = vmatprep.subr.bf16.mxu0 %v1095_v20  ;;  %v21_v6 = vld [vmem:[%s1400_s0 + $0x8] sm:$0xff] }
  0x16   :  { %1006 = vmatprep.subr.bf16.mxu1 %v1096_v21 }
  0x18   :  { %985 = vmatpush3.bf16.msra.mxu0 %v1097_v22 }
  0x19   :  { %1007 = vmatpush3.bf16.msra.mxu1 %v1098_v23  ;;  %986 = vmatprep.subr.bf16.mxu0 %v1099_v24 }
  0x1a   :  { %1008 = vmatprep.subr.bf16.mxu1 %v1100_v25 }
  0x1c   :  { %987 = vmatpush3.bf16.msra.mxu0 %v1101_v26 }
  0x1d   :  { %1009 = vmatpush3.bf16.msra.mxu1 %v1102_v27  ;;  %988 = vmatprep.subr.bf16.mxu0 %v1103_v29 }
  0x1e   :  { %1010 = vmatprep.subr.bf16.mxu1 %v1104_v30 }
  0x20   :  { %989 = vmatpush3.bf16.msra.mxu0 %v1105_v31 }
  0x21   :  { %1011 = vmatpush3.bf16.msra.mxu1 %v1106_v32  ;;  %1018 = vmatprep.subr.bf16.mxu0 %v1108_v35 }
  0x22   :  { %1040 = vmatprep.subr.bf16.mxu1 %v1109_v38 }
  0x23   :  { %611 = vmatmul.mubr.bf16.vlgmr.msra.gmra.mrb[0].mxu0 %v159_v42 }
  0x24   :  { %651 = vmatmul.mubr.bf16.vlgmr.msra.gmra.mrb[0].mxu1 %v166_v43  ;;  %1019 = vmatpush3.bf16.msra.mxu0 %v1110_v44 }
  0x25   :  { %1041 = vmatpush3.bf16.msra.mxu1 %v1111_v45  ;;  %1020 = vmatprep.subr.bf16.mxu0 %v1112_v48 }
  0x26   :  { %1042 = vmatprep.subr.bf16.mxu1 %v1113_v49 }
  0x28   :  { %1021 = vmatpush3.bf16.msra.mxu0 %v1114_v50 }
  0x29   :  { %1043 = vmatpush3.bf16.msra.mxu1 %v1115_v51  ;;  %1022 = vmatprep.subr.bf16.mxu0 %v1116_v52 }
  0x2a   :  { %1044 = vmatprep.subr.bf16.mxu1 %v1117_v53 }
  0x2c   :  { %1023 = vmatpush3.bf16.msra.mxu0 %v1118_v54 }
  0x2d   :  { %1045 = vmatpush3.bf16.msra.mxu1 %v1119_v55  ;;  %1024 = vmatprep.subr.bf16.mxu0 %v1120_v56 }
  0x2e   :  { %1046 = vmatprep.subr.bf16.mxu1 %v1121_v57 }
  0x30   :  { %1025 = vmatpush3.bf16.msra.mxu0 %v1122_v58 }
  0x31   :  { %1047 = vmatpush3.bf16.msra.mxu1 %v1123_v59  ;;  %1026 = vmatprep.subr.bf16.mxu0 %v1124_v60 }
  0x32   :  { %1048 = vmatprep.subr.bf16.mxu1 %v1125_v61 }
  0x34   :  { %1027 = vmatpush3.bf16.msra.mxu0 %v1126_v62 }
  0x35   :  { %1049 = vmatpush3.bf16.msra.mxu1 %v1127_v63  ;;  %1028 = vmatprep.subr.bf16.mxu0 %v1128_v0 }
  0x36   :  { %1050 = vmatprep.subr.bf16.mxu1 %v1129_v1 }
  0x37   :  { %7 = vsyncpa [#allocation4], 0  ;;  %v1134_v7 = vld [vmem:[%s1401_s1 + $0x130] sm:$0xff]   ;;  %v176_v9 = vrot.slane %v21_v6, %v1283_v41  ;;  %v169_v10 = vcombine.high %v21_v6, %v21_v6  ;;  %v1136_v11 = vld [vmem:[%s1401_s1 + $0x178] sm:$0xff]   ;;  %vm17_vm0 = vcmask 257024   ;;  %v1156_v18 = vmov 0.0  }
  0x38   :  { %1029 = vmatpush3.bf16.msra.mxu0 %v1130_v2  ;;  %v1135_v8 = vld [vmem:[%s1401_s1 + $0x1b0] sm:$0xff]   ;;  %v1137_v12 = vld [vmem:[%s1401_s1 + $0x1f8] sm:$0xff]   ;;  %18 = vst.msk [vmem:[#allocation2] sm:$0xf] %vm17_vm0, %v1156_v18  ;;  %vm1157_vm1 = vmmov 0   ;;  %vm745_vm2 = vcmask 261120  }
  0x39   :  { %1051 = vmatpush3.bf16.msra.mxu1 %v1131_v3  ;;  %1030 = vmatprep.subr.bf16.mxu0 %v1132_v4  ;;  %v184_v13 = vcombine.high %v176_v9, %v176_v9  ;;  %v183_v14 = vrot.slane %v169_v10, %v1283_v41  ;;  %v1138_v15 = vld [vmem:[%s1401_s1 + $0x138] sm:$0xff]   ;;  %v857_v52 = vsub.s32 0, %v1271_v33  ;;  %v875_v59 = vand.u32 127, %v156_v28  ;;  %s1143_s3 = scalar_lea.hbm %s1402_s2, 16 }
  0x3a   :  { %1052 = vmatprep.subr.bf16.mxu1 %v1133_v5  ;;  %v1139_v16 = vld [vmem:[%s1401_s1 + $0x1b8] sm:$0xff]   ;;  %vm880_vm6 = vcmask 27648   ;;  %p1144_p0 = scmp.ne.s32.totalorder %s1402_s2, %s1143_s3  ;;  %p1147_p1 = scmp.lt.u32.totalorder %s1143_s3, %s1402_s2 }
  0x3b   :  { %v185_v17 = vcombine.high %v183_v14, %v183_v14  ;;  %690 = vmatprep.mubr.bf16.mxu0 %v184_v13  ;;  %vm876_vm5 = vcmp.gt.s32.totalorder %v875_v59, %v1271_v33 }
  0x3c   :  { %1031 = vmatpush3.bf16.msra.mxu0 %v1134_v7  ;;  %v973_v2 = vsel %vm876_vm5, 1.0, %v1156_v18  ;;  %p1149_p2 = pnand %p1147_p1, %p1144_p0 }
  0x3d   :  { %1053 = vmatpush3.bf16.msra.mxu1 %v1135_v8  ;;  %1032 = vmatprep.subr.bf16.mxu0 %v1136_v11 }
  0x3e   :  { %1054 = vmatprep.subr.bf16.mxu1 %v1137_v12  ;;  %730 = vmatprep.mubr.bf16.mxu1 %v185_v17 }
  0x3f   :  { %v19_v43 = vld [vmem:[#allocation2] sm:$0xf] }
  0x40   :  { %1033 = vmatpush3.bf16.msra.mxu0 %v1138_v15 }
  0x41   :  { %1055 = vmatpush3.bf16.msra.mxu1 %v1139_v16  ;;  %1064 = vmatprep.subr.mxu0 %v1156_v18 }
  0x43   :  { %691 = vmatmul.mubr.bf16.vlgmr.msra.gmra.mrb[4].mxu0 %v176_v9 }
  0x44   :  { %731 = vmatmul.mubr.bf16.vlgmr.msra.gmra.mrb[4].mxu1 %v183_v14  ;;  %1066 = vmatprep.mubr.msk.f32.mxu0 %vm1157_vm1, %v1156_v18 }
  0xf6   :  { %v990_v19 = vpop.f32.mrb[0].mxu0 }
  0xf7   :  { %v1012_v20 = vpop.f32.mrb[0].mxu1  ;;  %v991_v21 = vpop.f32.mrb[1].mxu0 }
  0xf8   :  { %v1013_v22 = vpop.f32.mrb[1].mxu1  ;;  %v992_v23 = vadd.f32 %v991_v21, %v990_v19  ;;  %v993_v25 = vpop.f32.mrb[2].mxu0 }
  0xf9   :  { %v1014_v24 = vadd.f32 %v1013_v22, %v1012_v20  ;;  %v1015_v26 = vpop.f32.mrb[2].mxu1  ;;  %v994_v27 = vpop.f32.mrb[3].mxu0 }
  0xfa   :  { %v1016_v29 = vpop.f32.mrb[3].mxu1 }
  0xfb   :  { %v653_v30 = vadd.f32 %v1014_v24, %v992_v23 }
 0x116   :  { %v1034_v31 = vpop.f32.mrb[4].mxu0 }
 0x117   :  { %v1056_v32 = vpop.f32.mrb[4].mxu1  ;;  %v1035_v34 = vpop.f32.mrb[5].mxu0 }
 0x118   :  { %v1057_v35 = vpop.f32.mrb[5].mxu1  ;;  %v1036_v36 = vadd.f32 %v1035_v34, %v1034_v31  ;;  %v1037_v38 = vpop.f32.mrb[6].mxu0 }
 0x119   :  { %v1058_v37 = vadd.f32 %v1057_v35, %v1056_v32  ;;  %v1059_v39 = vpop.f32.mrb[6].mxu1  ;;  %v1038_v40 = vpop.f32.mrb[7].mxu0 }
 0x11a   :  { %v1060_v41 = vpop.f32.mrb[7].mxu1  ;;  %v693_v42 = vadd.f32 %v1036_v36, %v653_v30 }
 0x11c   :  { %v733_v44 = vadd.f32 %v1058_v37, %v693_v42 }
 0x11e   :  { %v738_v45 = vadd.f32 %v733_v44, %v19_v43 }
 0x120   :  { %740 = vst.msk [vmem:[#allocation2] sm:$0xf] %vm17_vm0, %v738_v45 }
 0x127   :  { %v744_v46 = vld [vmem:[#allocation2] sm:$0xf] }
 0x128   :  { %1065 = vmatpush3.xpose.msk.msra.mxu0 %vm745_vm2, %v744_v46  ;;  %v819_v47 = vmul.f32 %v744_v46, %v744_v46 }
 0x12a   :  { %v820_v48 = vsel %vm17_vm0, %v819_v47, 0.0 }
 0x12b   :  { %821 = vadd.xlane.f32.xlu0 %v820_v48  ;;  %1067 = vmatmul.mubr.msk.f32.vlgmr.msra.gmra.mrb[8].mxu0 %vm745_vm2, %v744_v46 }
 0x1b8   :  { %v822_v49 = vpop.xlane.xlu0 %821 }
 0x1b9   :  { %823 = vxpose.xlu0.b32.start.end [1/1] (short) (narrow) %v822_v49, 8 }
 0x1fe   :  { %v815_v50 = vpop.f32.mrb[8].mxu0 }
 0x1ff   :  { %v1068_v51 = vpop.f32.mrb[9].mxu0  ;;  %v860_v55 = vmul.f32 2.0, %v815_v50 }
 0x239   :  { %v839_v53 = vpop.trf.xlu0 }
 0x23a   :  { %v858_v54 = vrot.slane %v839_v53, %v857_v52 }
 0x23c   :  { %v859_v56 = vadd.f32 %v858_v54, %v822_v49 }
 0x23e   :  { %v861_v57 = vsub.f32 %v859_v56, %v860_v55 }
 0x240   :  { %v862_v58 = vmax.f32 %v861_v57, 0.0 }
 0x242   :  { %1141 = vrsqrt.f32 %v862_v58  ;;  %vm865_vm3 = vcmp.eq.f32.partialorder %v862_v58, inf  ;;  %v868_v62 = vand.u32 2147483648, %v862_v58  ;;  %vm867_vm4 = vcmp.eq.f32.partialorder %v862_v58, 0.0 }
 0x24c   :  { %v1142_v60 = vpop.eup %1141 }
 0x24d   :  { %v864_v61 = vmul.f32 %v1142_v60, %v862_v58 }
 0x24f   :  { %v866_v63 = vsel %vm865_vm3, %v862_v58, %v864_v61 }
 0x250   :  { %v869_v0 = vsel %vm867_vm4, %v868_v62, %v866_v63 }
 0x251   :  { %v870_v1 = vsub.f32 10.0, %v869_v0 }
 0x253   :  { %v871_v3 = vmax.f32 %v870_v1, 0.0 }
 0x255   :  { %v879_v4 = vmul.f32 %v973_v2, %v871_v3 }
 0x257   :  { %v881_v5 = vsel %vm880_vm6, %v879_v4, 0.0 }
 0x258   :  { %882 = vadd.xlane.f32.xlu1 %v881_v5 }
 0x2e5   :  { %v883_v6 = vpop.xlane.xlu1 %882 }
 0x2e6   :  { %v884_v7 = vrot.slane %v883_v6, 4 }
 0x2e8   :  { %v885_v8 = vadd.f32 %v884_v7, %v883_v6 }
 0x2ea   :  { %v886_v28 = vrot.slane %v885_v8, 2 }
 0x2ec   :  { %v887_v9 = vadd.f32 %v886_v28, %v885_v8 }
 0x2ee   :  { %v888_v10 = vrot.slane %v887_v9, 1 }
 0x2f0   :  { %v889_v11 = vadd.f32 %v888_v10, %v887_v9 }
 0x2f2   :  { %1069 = vpush %v889_v11 }
 0x323   :  { %s1070_s1 = spop %1069 }
 0x324   :  { %s891_s28 = smul.f32 0.16666667, %s1070_s1 }
 0x326   :  { %893 = sst [smem:[#allocation3]] %s891_s28 }
 0x327   :  { %1152 = shalt.err (!%p1149_p2)
}
 0x328   :  { %s1158_s8 = smov [#allocation3]  }
 0x329   :  { %901 = dma.smem_to_hbm %s1158_s8, 16, %s1402_s2, [#allocation4]  }
 0x32a   :  { %1153 = dma.done.wait [#allocation4], 16  }
 0x32b   :  { %1154 = vsyncadd [#allocation4], 4294967280 }
 0x32c   :  { %905 = sfence }
 0x32d   :  { %906 = vsyncpa [#allocation4], 1 }

</bundles_post_ra>
